<compile_context>
chip_gen: v5e
topology: v5e:2x2
jax: 0.10.0
libtpu: 0.0.40
codegen_flags: <defaults>
</compile_context>

<pallas_src>
import jax
import jax.numpy as jnp
from jax import lax
from jax.experimental import pallas as pl
from jax.experimental.pallas import tpu as pltpu


def _round_up(x, m):
    return ((x + m - 1) // m) * m


def head_part_one_kernel(x_ref, w1_ref, b1_ref, w2_ref, b2_ref, o_ref, acc_ref):
    """One (batch-tile, k-tile) grid step."""
    k = pl.program_id(1)

    @pl.when(k == 0)
    def _init():
        acc_ref[...] = jnp.zeros_like(acc_ref)

    x = x_ref[...]
    if x.dtype != w1_ref.dtype:          # trace-time check (mixed-precision path)
        x = x.astype(w1_ref.dtype)

    # fc1 partial product: x[tm, tk] . w1[R, tk]^T  (contract feature axis)
    acc_ref[...] += lax.dot_general(
        x, w1_ref[...],
        dimension_numbers=(((1,), (1,)), ((), ())),
        preferred_element_type=jnp.float32)

    @pl.when(k == pl.num_programs(1) - 1)
    def _finalize():
        h = jnp.maximum(acc_ref[...] + b1_ref[...], 0.0)      # bias + ReLU, f32 VPU
        if h.dtype != w2_ref.dtype:                            # downcast only if bf16 weights
            h = h.astype(w2_ref.dtype)
        y = lax.dot_general(
            h, w2_ref[...],
            dimension_numbers=(((1,), (1,)), ((), ())),
            preferred_element_type=jnp.float32)
        o_ref[...] = jnp.maximum(y + b2_ref[...], 0.0).astype(o_ref.dtype)


def head_part_one(x, w1, b1, w2, b2, *, weight_dtype=None,
                  vmem_budget_bytes=24 * 1024 * 1024):
    """x: [N, ...] (flattened over trailing dims); w1: [R, F]; w2: [R, R]. Returns [N, R]."""
    x2d = x.reshape(x.shape[0], -1)                  # flatten(1)
    N, F = x2d.shape
    R = w1.shape[0]
    assert w1.shape == (R, F) and w2.shape == (R, R)
    assert b1.shape[-1] == R and b2.shape[-1] == R

    if weight_dtype is not None:
        w1 = w1.astype(weight_dtype)
        w2 = w2.astype(weight_dtype)
    # Biases stay f32: they are added to the f32 accumulator.
    b1_2d = b1.reshape(1, R).astype(jnp.float32)
    b2_2d = b2.reshape(1, R).astype(jnp.float32)

    x_isz = jnp.dtype(x2d.dtype).itemsize
    w_isz = jnp.dtype(w1.dtype).itemsize
    o_isz = x_isz

    # ---- K (feature) tiling: only for large F; tk must divide F exactly and be
    #      a multiple of 128 so no garbage lanes enter the reduction. ----
    if F <= 2048:
        tk = F
    else:
        tk = F
        for cand in (2048, 1536, 1024, 768, 512, 384, 256, 128):
            if F % cand == 0:
                tk = cand
                break
    nk = F // tk

    # ---- M (batch) tiling: as large as the VMEM budget allows, aligned to the
    #      sublane tile (8 for 32-bit, 16 for 16-bit inputs), capped at 256. ----
    m_align = 8 if x_isz >= 4 else 16
    resident = R * R * w_isz + 2 * R * 4                       # w2 + biases (single-buffered)
    resident += (1 if nk == 1 else 2) * R * tk * w_isz         # w1 slab(s)
    per_row = 2 * tk * x_isz + 2 * R * o_isz + R * 4           # x (2x), out (2x), f32 acc
    tm = int(max(vmem_budget_bytes - resident, 0) // max(per_row, 1))
    tm = (min(256, tm) // m_align) * m_align
    tm = max(m_align, tm)
    tm = min(tm, _round_up(N, m_align))
    # keep >= 2 batch blocks when the batch allows it (megacore / v7x 2-TC sharding)
    if pl.cdiv(N, tm) == 1 and N >= 2 * m_align:
        tm = max(m_align, _round_up(pl.cdiv(N, 2), m_align))

    grid = (pl.cdiv(N, tm), nk)

    const = pl.Buffered(1)   # grid-invariant operands: no re-fetch, no double buffer
    if nk == 1:
        w1_spec = pl.BlockSpec((R, tk), lambda i, k: (0, k), pipeline_mode=const)
    else:
        w1_spec = pl.BlockSpec((R, tk), lambda i, k: (0, k))

    in_specs = [
        pl.BlockSpec((tm, tk), lambda i, k: (i, k)),                       # x tile
        w1_spec,                                                           # w1 [R, F] slab
        pl.BlockSpec((1, R), lambda i, k: (0, 0), pipeline_mode=const),    # b1
        pl.BlockSpec((R, R), lambda i, k: (0, 0), pipeline_mode=const),    # w2
        pl.BlockSpec((1, R), lambda i, k: (0, 0), pipeline_mode=const),    # b2
    ]
    out_spec = pl.BlockSpec((tm, R), lambda i, k: (i, 0))

    needed = (2 * tm * tk * x_isz
              + (1 if nk == 1 else 2) * R * tk * w_isz
              + R * R * w_isz + 2 * R * 4
              + 2 * tm * R * o_isz
              + tm * R * 4)
    vmem_limit = int(min(max(2 * needed, 16 * 1024 * 1024), 48 * 1024 * 1024))

    cost = pl.CostEstimate(
        flops=2 * N * F * R + 2 * N * R * R,
        transcendentals=0,
        bytes_accessed=(N * F * x_isz + (F * R + R * R) * w_isz
                        + 2 * R * 4 + N * R * o_isz),
    )

    return pl.pallas_call(
        head_part_one_kernel,
        out_shape=jax.ShapeDtypeStruct((N, R), x2d.dtype),
        grid_spec=pltpu.PrefetchScalarGridSpec(
            num_scalar_prefetch=0,
            grid=grid,
            in_specs=in_specs,
            out_specs=out_spec,
            scratch_shapes=[pltpu.VMEM((tm, R), jnp.float32)],
        ),
        compiler_params=pltpu.CompilerParams(
            dimension_semantics=("parallel", "arbitrary"),
            vmem_limit_bytes=vmem_limit,
        ),
        cost_estimate=cost,
    )(x2d, w1, b1_2d, w2, b2_2d)


if __name__ == "__main__":
    # Small shapes consistent with the module: flatten(1) of [8, 4, 8, 8] -> 256
    # so in_channels = 256, representation_size = 128, batch = 8.
    N, C, H, W = 8, 4, 8, 8
    in_channels = C * H * W           # 256
    representation_size = 128

    key = jax.random.PRNGKey(0)
    kx, k1w, k1b, k2w, k2b = jax.random.split(key, 5)

    x = jax.random.normal(kx, (N, C, H, W), dtype=jnp.float32)
    # deterministic "init" matching nn.Linear parameter shapes [out, in]
    w1 = jax.random.normal(k1w, (representation_size, in_channels),
                           dtype=jnp.float32) * 0.02
    b1 = jax.random.normal(k1b, (representation_size,), dtype=jnp.float32) * 0.01
    w2 = jax.random.normal(k2w, (representation_size, representation_size),
                           dtype=jnp.float32) * 0.02
    b2 = jax.random.normal(k2b, (representation_size,), dtype=jnp.float32) * 0.01

    out = head_part_one(x, w1, b1, w2, b2)
    out = jax.block_until_ready(out)

    # pure-JAX reference for sanity
    xf = x.reshape(N, -1)
    ref = jnp.maximum(xf @ w1.T + b1, 0.0)
    ref = jnp.maximum(ref @ w2.T + b2, 0.0)
    assert out.shape == (N, representation_size)
    assert jnp.allclose(out, ref, atol=1e-4, rtol=1e-4)

    print("KERNEL_OK")
</pallas_src>

<mosaic_0001>
module attributes {stable_mosaic.version = 11 : i64} {
  func.func @head_part_one_kernel(%arg0: i32, %arg1: i32, %arg2: memref<8x256xf32, #tpu.memory_space<vmem>>, %arg3: memref<128x256xf32, #tpu.memory_space<vmem>>, %arg4: memref<1x128xf32, #tpu.memory_space<vmem>>, %arg5: memref<128x128xf32, #tpu.memory_space<vmem>>, %arg6: memref<1x128xf32, #tpu.memory_space<vmem>>, %arg7: memref<8x128xf32, #tpu.memory_space<vmem>>, %arg8: memref<8x128xf32, #tpu.memory_space<vmem>>) attributes {dimension_semantics = [#tpu.dimension_semantics<parallel>, #tpu.dimension_semantics<arbitrary>], iteration_bounds = array<i64: 1, 1>, scalar_prefetch = 0 : i64, scratch_operands = 1 : i64, tpu.core_type = #tpu.core_type<tc>, window_params = [{transform_indices = @transform_0, window_bounds = array<i64: 8, 256>}, {pipeline_mode = #tpu.pipeline_mode<synchronous>, transform_indices = @transform_1, window_bounds = array<i64: 128, 256>}, {pipeline_mode = #tpu.pipeline_mode<synchronous>, transform_indices = @transform_2, window_bounds = array<i64: 1, 128>}, {pipeline_mode = #tpu.pipeline_mode<synchronous>, transform_indices = @transform_3, window_bounds = array<i64: 128, 128>}, {pipeline_mode = #tpu.pipeline_mode<synchronous>, transform_indices = @transform_4, window_bounds = array<i64: 1, 128>}, {transform_indices = @transform_5, window_bounds = array<i64: 8, 128>}]} {
    %c0_i32 = arith.constant 0 : i32
    %0 = arith.cmpi eq, %arg1, %c0_i32 : i32
    %1 = arith.extui %0 : i1 to i32
    %c0_i32_0 = arith.constant 0 : i32
    %2 = arith.cmpi ne, %1, %c0_i32_0 : i32
    scf.if %2 {
      %cst_10 = arith.constant 0.000000e+00 : f32
      %12 = vector.broadcast %cst_10 : f32 to vector<8x128xf32>
      %c0_11 = arith.constant 0 : index
      %c0_12 = arith.constant 0 : index
      %13 = vector.load %arg8[%c0_11, %c0_12] : memref<8x128xf32, #tpu.memory_space<vmem>>, vector<8x128xf32>
      tpu.vector_store %arg8[%c0_11, %c0_12], %12 {strides = array<i32>} : memref<8x128xf32, #tpu.memory_space<vmem>>, vector<8x128xf32>,
    } else {
    }
    %c0 = arith.constant 0 : index
    %c0_1 = arith.constant 0 : index
    %3 = vector.load %arg2[%c0, %c0_1] : memref<8x256xf32, #tpu.memory_space<vmem>>, vector<8x256xf32>
    %c0_2 = arith.constant 0 : index
    %c0_3 = arith.constant 0 : index
    %4 = vector.load %arg8[%c0_2, %c0_3] : memref<8x128xf32, #tpu.memory_space<vmem>>, vector<8x128xf32>
    %c0_4 = arith.constant 0 : index
    %c0_5 = arith.constant 0 : index
    %5 = vector.load %arg3[%c0_4, %c0_5] : memref<128x256xf32, #tpu.memory_space<vmem>>, vector<128x256xf32>
    %cst = arith.constant dense<0.000000e+00> : vector<8x128xf32>
    %6 = tpu.matmul %3, %5, %cst {dimension_numbers = #tpu.dot_dimension_numbers<[1], [1], [0], [0], [0, 0, 1, 0], [], []>} : vector<8x256xf32>, vector<128x256xf32>, vector<8x128xf32> -> vector<8x128xf32>
    %7 = arith.addf %4, %6 : vector<8x128xf32>
    %c0_6 = arith.constant 0 : index
    %c0_7 = arith.constant 0 : index
    %8 = vector.load %arg8[%c0_6, %c0_7] : memref<8x128xf32, #tpu.memory_space<vmem>>, vector<8x128xf32>
    tpu.vector_store %arg8[%c0_6, %c0_7], %7 {strides = array<i32>} : memref<8x128xf32, #tpu.memory_space<vmem>>, vector<8x128xf32>,
    %c0_i32_8 = arith.constant 0 : i32
    %9 = arith.cmpi eq, %arg1, %c0_i32_8 : i32
    %10 = arith.extui %9 : i1 to i32
    %c0_i32_9 = arith.constant 0 : i32
    %11 = arith.cmpi ne, %10, %c0_i32_9 : i32
    scf.if %11 {
      %c0_10 = arith.constant 0 : index
      %c0_11 = arith.constant 0 : index
      %12 = vector.load %arg8[%c0_10, %c0_11] : memref<8x128xf32, #tpu.memory_space<vmem>>, vector<8x128xf32>
      %c0_12 = arith.constant 0 : index
      %c0_13 = arith.constant 0 : index
      %13 = vector.load %arg4[%c0_12, %c0_13] : memref<1x128xf32, #tpu.memory_space<vmem>>, vector<1x128xf32>
      %14 = vector.broadcast %13 : vector<1x128xf32> to vector<8x128xf32>
      %15 = arith.addf %12, %14 : vector<8x128xf32>
      %cst_14 = arith.constant 0.000000e+00 : f32
      %16 = vector.broadcast %cst_14 : f32 to vector<8x128xf32>
      %17 = arith.maximumf %15, %16 : vector<8x128xf32>
      %c0_15 = arith.constant 0 : index
      %c0_16 = arith.constant 0 : index
      %18 = vector.load %arg5[%c0_15, %c0_16] : memref<128x128xf32, #tpu.memory_space<vmem>>, vector<128x128xf32>
      %cst_17 = arith.constant dense<0.000000e+00> : vector<8x128xf32>
      %19 = tpu.matmul %17, %18, %cst_17 {dimension_numbers = #tpu.dot_dimension_numbers<[1], [1], [0], [0], [0, 0, 1, 0], [], []>} : vector<8x128xf32>, vector<128x128xf32>, vector<8x128xf32> -> vector<8x128xf32>
      %c0_18 = arith.constant 0 : index
      %c0_19 = arith.constant 0 : index
      %20 = vector.load %arg6[%c0_18, %c0_19] : memref<1x128xf32, #tpu.memory_space<vmem>>, vector<1x128xf32>
      %21 = vector.broadcast %20 : vector<1x128xf32> to vector<8x128xf32>
      %22 = arith.addf %19, %21 : vector<8x128xf32>
      %cst_20 = arith.constant 0.000000e+00 : f32
      %23 = vector.broadcast %cst_20 : f32 to vector<8x128xf32>
      %24 = arith.maximumf %22, %23 : vector<8x128xf32>
      %c0_21 = arith.constant 0 : index
      %c0_22 = arith.constant 0 : index
      %25 = vector.load %arg7[%c0_21, %c0_22] : memref<8x128xf32, #tpu.memory_space<vmem>>, vector<8x128xf32>
      tpu.vector_store %arg7[%c0_21, %c0_22], %24 {strides = array<i32>} : memref<8x128xf32, #tpu.memory_space<vmem>>, vector<8x128xf32>,
    } else {
    }
    return
  }
  func.func @transform_0(%arg0: i32, %arg1: i32) -> (i32, i32) {
    %c0_i32 = arith.constant 0 : i32
    return %arg0, %arg1 : i32, i32
  }
  func.func @transform_1(%arg0: i32, %arg1: i32) -> (i32, i32) {
    %c0_i32 = arith.constant 0 : i32
    %c0_i32_0 = arith.constant 0 : i32
    return %c0_i32, %arg1 : i32, i32
  }
  func.func @transform_2(%arg0: i32, %arg1: i32) -> (i32, i32) {
    %c0_i32 = arith.constant 0 : i32
    %c0_i32_0 = arith.constant 0 : i32
    %c0_i32_1 = arith.constant 0 : i32
    return %c0_i32, %c0_i32_0 : i32, i32
  }
  func.func @transform_3(%arg0: i32, %arg1: i32) -> (i32, i32) {
    %c0_i32 = arith.constant 0 : i32
    %c0_i32_0 = arith.constant 0 : i32
    %c0_i32_1 = arith.constant 0 : i32
    return %c0_i32, %c0_i32_0 : i32, i32
  }
  func.func @transform_4(%arg0: i32, %arg1: i32) -> (i32, i32) {
    %c0_i32 = arith.constant 0 : i32
    %c0_i32_0 = arith.constant 0 : i32
    %c0_i32_1 = arith.constant 0 : i32
    return %c0_i32, %c0_i32_0 : i32, i32
  }
  func.func @transform_5(%arg0: i32, %arg1: i32) -> (i32, i32) {
    %c0_i32 = arith.constant 0 : i32
    %c0_i32_0 = arith.constant 0 : i32
    return %arg0, %c0_i32 : i32, i32
  }
}

</mosaic_0001>

<bundles_post_ra>
// kernel: tpu_custom_call.1
= control target key start
LH: loop header
LB: loop body
LE: loop exit
PB: predicated region body
PF: predicated region fallthrough
CT: control target
= control target key end

     0   :  { %10 = vsyncpa [#allocation4], 0  ;;  %s386_s0 = inlined_call_operand.hbm [shape: f32[8,256], index: 0, kind: input, shape index: {}]   ;;  %s387_s1 = inlined_call_operand.hbm [shape: f32[128,256], index: 1, kind: input, shape index: {}]   ;;  %s388_s2 = inlined_call_operand.vmem [shape: f32[1,128], index: 2, kind: input, shape index: {}]   ;;  %s389_s3 = inlined_call_operand.hbm [shape: f32[128,128], index: 3, kind: input, shape index: {}]   ;;  %s390_s4 = inlined_call_operand.vmem [shape: f32[1,128], index: 4, kind: input, shape index: {}]   ;;  %s391_s5 = inlined_call_operand.hbm [shape: f32[8,128], index: 5, kind: output, shape index: {}]  }
   0x1   :  { %11 = vsyncpa [#allocation7], 0  ;;  %s28_s20 = sshll.u32 %s387_s1, 4  ;;  %s29_s20 = int_to_ptr.hbm [resolvable:$true] %s28_s20 }
   0x2   :  { %12 = vsyncpa [#allocation5], 0  ;;  %s330_s21 = smov [#allocation6]   ;;  %s18_s25 = sshll.u32 %s386_s0, 4  ;;  %s19_s25 = int_to_ptr.hbm [resolvable:$true] %s18_s25 }
   0x3   :  { %s30_s22 = sshll.u32 %s330_s21, 4  ;;  %s331_s26 = smov 256   ;;  %s31_s22 = int_to_ptr.vmem [resolvable:$true] %s30_s22 }
   0x4   :  { %s332_s27 = smov 16   ;;  %s333_s28 = smov [#allocation3]  }
   0x5   :  { %36 = dma.hbm_to_vmem [thread:$0]  %s29_s20, 4096, %s31_s22, [#allocation7], %s331_s26, %s331_s26, %s332_s27  }
   0x6   :  { %s20_s29 = sshll.u32 %s333_s28, 4  ;;  %s43_s7 = sshll.u32 %s389_s3, 4  ;;  %s21_s29 = int_to_ptr.vmem [resolvable:$true] %s20_s29  ;;  %s44_s7 = int_to_ptr.hbm [resolvable:$true] %s43_s7 }
   0x7   :  { %23 = dma.hbm_to_vmem [thread:$0]  %s19_s25, 256, %s21_s29, [#allocation4]  }
   0x8   :  { %s334_s1 = smov [#allocation8]   ;;  %s335_s9 = smov 128  }
   0x9   :  { %s45_s8 = sshll.u32 %s334_s1, 4  ;;  %s336_s10 = smov 8   ;;  %s46_s8 = int_to_ptr.vmem [resolvable:$true] %s45_s8 }
   0xa   :  { %51 = dma.hbm_to_vmem [thread:$0]  %s44_s7, 2048, %s46_s8, [#allocation7], %s335_s9, %s335_s9, %s336_s10  }
   0xb   :  { %324 = dma.done.wait [#allocation4], 256  }
   0xc   :  { %325 = vsyncadd [#allocation4], 4294967040 }
   0xd   :  { %326 = dma.done.wait [#allocation7], 6144  }
   0xe   :  { %327 = vsyncadd [#allocation7], 4294961152  ;;  %v104_v0 = vld [vmem:[#allocation6 + $0xf0] sm:$0xff]  ;;  %v105_v1 = vld [vmem:[#allocation6 + $0xf8] sm:$0xff]  ;;  %s337_s13 = smov [#allocation9]   ;;  %s207_s17 = sshll.u32 %s391_s5, 4  ;;  %s208_s17 = int_to_ptr.hbm [resolvable:$true] %s207_s17 }
   0xf   :  { %106 = vmatpush.xpose.msra.mxu0 %v104_v0  ;;  %126 = vmatpush.xpose.msra.mxu1 %v105_v1  ;;  %v102_v2 = vld [vmem:[#allocation6 + $0xe0] sm:$0xff]  ;;  %v103_v3 = vld [vmem:[#allocation6 + $0xe8] sm:$0xff]  ;;  %v100_v4 = vld [vmem:[#allocation6 + $0xd0] sm:$0xff]  ;;  %s205_s14 = sshll.u32 %s337_s13, 4  ;;  %s206_s14 = int_to_ptr.vmem [resolvable:$true] %s205_s14 }
  0x10   :  { %v101_v5 = vld [vmem:[#allocation6 + $0xd8] sm:$0xff]  ;;  %v98_v6 = vld [vmem:[#allocation6 + $0xc0] sm:$0xff]  ;;  %v99_v7 = vld [vmem:[#allocation6 + $0xc8] sm:$0xff] }
  0x11   :  { %v96_v8 = vld [vmem:[#allocation6 + $0xb0] sm:$0xff]  ;;  %v97_v9 = vld [vmem:[#allocation6 + $0xb8] sm:$0xff]  ;;  %v94_v10 = vld [vmem:[#allocation6 + $0xa0] sm:$0xff] }
  0x12   :  { %v95_v11 = vld [vmem:[#allocation6 + $0xa8] sm:$0xff]  ;;  %v92_v12 = vld [vmem:[#allocation6 + $0x90] sm:$0xff]  ;;  %v93_v13 = vld [vmem:[#allocation6 + $0x98] sm:$0xff] }
  0x13   :  { %107 = vmatpush.xpose.msra.mxu0 %v102_v2  ;;  %127 = vmatpush.xpose.msra.mxu1 %v103_v3  ;;  %v90_v14 = vld [vmem:[#allocation6 + $0x80] sm:$0xff]  ;;  %v91_v15 = vld [vmem:[#allocation6 + $0x88] sm:$0xff]  ;;  %v88_v16 = vld [vmem:[#allocation6 + $0x70] sm:$0xff] }
  0x14   :  { %v89_v17 = vld [vmem:[#allocation6 + $0x78] sm:$0xff]  ;;  %v86_v19 = vld [vmem:[#allocation6 + $0x60] sm:$0xff]  ;;  %v87_v20 = vld [vmem:[#allocation6 + $0x68] sm:$0xff] }
  0x15   :  { %v173_v18 = vld [vmem:[#allocation8 + $0x78] sm:$0xff]  ;;  %v172_v21 = vld [vmem:[#allocation8 + $0x70] sm:$0xff]  ;;  %v171_v24 = vld [vmem:[#allocation8 + $0x68] sm:$0xff] }
  0x16   :  { %178 = vmatpush.xpose.msra.mxu2 %v173_v18  ;;  %v84_v22 = vld [vmem:[#allocation6 + $0x50] sm:$0xff]  ;;  %v85_v23 = vld [vmem:[#allocation6 + $0x58] sm:$0xff]  ;;  %v82_v25 = vld [vmem:[#allocation6 + $0x40] sm:$0xff] }
  0x17   :  { %108 = vmatpush.xpose.msra.mxu0 %v100_v4  ;;  %128 = vmatpush.xpose.msra.mxu1 %v101_v5  ;;  %v83_v26 = vld [vmem:[#allocation6 + $0x48] sm:$0xff]  ;;  %v170_v27 = vld [vmem:[#allocation8 + $0x60] sm:$0xff]  ;;  %v80_v28 = vld [vmem:[#allocation6 + $0x30] sm:$0xff] }
  0x18   :  { %v81_v29 = vld [vmem:[#allocation6 + $0x38] sm:$0xff]  ;;  %v78_v31 = vld [vmem:[#allocation6 + $0x20] sm:$0xff]  ;;  %v79_v32 = vld [vmem:[#allocation6 + $0x28] sm:$0xff] }
  0x19   :  { %v169_v30 = vld [vmem:[#allocation8 + $0x58] sm:$0xff]  ;;  %v168_v33 = vld [vmem:[#allocation8 + $0x50] sm:$0xff]  ;;  %v167_v36 = vld [vmem:[#allocation8 + $0x48] sm:$0xff] }
  0x1a   :  { %179 = vmatpush.xpose.msra.mxu2 %v172_v21  ;;  %v76_v34 = vld [vmem:[#allocation6 + $0x10] sm:$0xff]  ;;  %v77_v35 = vld [vmem:[#allocation6 + $0x18] sm:$0xff]  ;;  %v74_v37 = vld [vmem:[#allocation6] sm:$0xff] }
  0x1b   :  { %109 = vmatpush.xpose.msra.mxu0 %v98_v6  ;;  %129 = vmatpush.xpose.msra.mxu1 %v99_v7  ;;  %v75_v38 = vld [vmem:[#allocation6 + $0x8] sm:$0xff]  ;;  %v166_v39 = vld [vmem:[#allocation8 + $0x40] sm:$0xff]  ;;  %v71_v40 = vld [vmem:[#allocation3] sm:$0xff] }
  0x1c   :  { %v72_v41 = vld [vmem:[#allocation3 + $0x8] sm:$0xff]  ;;  %v164_v43 = vld [vmem:[#allocation8 + $0x30] sm:$0xff]  ;;  %v163_v44 = vld [vmem:[#allocation8 + $0x28] sm:$0xff] }
  0x1d   :  { %v165_v42 = vld [vmem:[#allocation8 + $0x38] sm:$0xff]  ;;  %v162_v45 = vld [vmem:[#allocation8 + $0x20] sm:$0xff]  ;;  %v160_v47 = vld [vmem:[#allocation8 + $0x10] sm:$0xff] }
  0x1e   :  { %180 = vmatpush.xpose.msra.mxu2 %v171_v24  ;;  %v161_v46 = vld [vmem:[#allocation8 + $0x18] sm:$0xff]  ;;  %v159_v48 = vld [vmem:[#allocation8 + $0x8] sm:$0xff]  ;;  %v158_v49 = vld [vmem:[#allocation8] sm:$0xff] }
  0x1f   :  { %110 = vmatpush.xpose.msra.mxu0 %v96_v8  ;;  %130 = vmatpush.xpose.msra.mxu1 %v97_v9  ;;  %v226_v50 = vld [vmem:[%s388_s2] ss:$0 sm:$0xff] }
  0x20   :  { %v227_v56 = vld [vmem:[%s390_s4] ss:$0 sm:$0xff] }
  0x22   :  { %181 = vmatpush.xpose.msra.mxu2 %v170_v27 }
  0x23   :  { %111 = vmatpush.xpose.msra.mxu0 %v94_v10  ;;  %131 = vmatpush.xpose.msra.mxu1 %v95_v11 }
  0x26   :  { %182 = vmatpush.xpose.msra.mxu2 %v169_v30 }
  0x27   :  { %112 = vmatpush.xpose.msra.mxu0 %v92_v12  ;;  %132 = vmatpush.xpose.msra.mxu1 %v93_v13 }
  0x2a   :  { %183 = vmatpush.xpose.msra.mxu2 %v168_v33 }
  0x2b   :  { %113 = vmatpush.xpose.msra.mxu0 %v90_v14  ;;  %133 = vmatpush.xpose.msra.mxu1 %v91_v15 }
  0x2e   :  { %184 = vmatpush.xpose.msra.mxu2 %v167_v36 }
  0x2f   :  { %114 = vmatpush.xpose.msra.mxu0 %v88_v16  ;;  %134 = vmatpush.xpose.msra.mxu1 %v89_v17 }
  0x32   :  { %185 = vmatpush.xpose.msra.mxu2 %v166_v39 }
  0x33   :  { %115 = vmatpush.xpose.msra.mxu0 %v86_v19  ;;  %135 = vmatpush.xpose.msra.mxu1 %v87_v20 }
  0x36   :  { %186 = vmatpush.xpose.msra.mxu2 %v165_v42 }
  0x37   :  { %116 = vmatpush.xpose.msra.mxu0 %v84_v22  ;;  %136 = vmatpush.xpose.msra.mxu1 %v85_v23 }
  0x3a   :  { %187 = vmatpush.xpose.msra.mxu2 %v164_v43 }
  0x3b   :  { %117 = vmatpush.xpose.msra.mxu0 %v82_v25  ;;  %137 = vmatpush.xpose.msra.mxu1 %v83_v26 }
  0x3e   :  { %188 = vmatpush.xpose.msra.mxu2 %v163_v44 }
  0x3f   :  { %118 = vmatpush.xpose.msra.mxu0 %v80_v28  ;;  %138 = vmatpush.xpose.msra.mxu1 %v81_v29 }
  0x42   :  { %189 = vmatpush.xpose.msra.mxu2 %v162_v45 }
  0x43   :  { %119 = vmatpush.xpose.msra.mxu0 %v78_v31  ;;  %139 = vmatpush.xpose.msra.mxu1 %v79_v32 }
  0x46   :  { %190 = vmatpush.xpose.msra.mxu2 %v161_v46 }
  0x47   :  { %120 = vmatpush.xpose.msra.mxu0 %v76_v34  ;;  %140 = vmatpush.xpose.msra.mxu1 %v77_v35 }
  0x4a   :  { %191 = vmatpush.xpose.msra.mxu2 %v160_v47 }
  0x4b   :  { %121 = vmatpush.xpose.msra.mxu0 %v74_v37  ;;  %141 = vmatpush.xpose.msra.mxu1 %v75_v38 }
  0x4e   :  { %122 = vmatmul.f32.vlgmr.msra.gmra.mxu0 %v71_v40  ;;  %142 = vmatmul.f32.vlgmr.msra.gmra.mxu1 %v72_v41 }
  0x4f   :  { %192 = vmatpush.xpose.msra.mxu2 %v159_v48 }
  0x53   :  { %193 = vmatpush.xpose.msra.mxu2 %v158_v49 }
  0xcb   :  { %v123_v51 = vpop.f32.mrf.mxu0  ;;  %v143_v52 = vpop.f32.mrf.mxu1 }
  0xcc   :  { %v144_v53 = vadd.f32 %v143_v52, %v123_v51 }
  0xce   :  { %v156_v54 = vadd.f32 %v226_v50, %v144_v53 }
  0xd0   :  { %v157_v55 = vmax.f32 %v156_v54, 0.0 }
  0xd2   :  { %194 = vmatmul.f32.vlgmr.msra.gmra.mxu2 %v157_v55 }
 0x155   :  { %v195_v57 = vpop.f32.mrf.mxu2 }
 0x156   :  { %v196_v58 = vadd.f32 %v227_v56, %v195_v57 }
 0x158   :  { %v198_v59 = vmax.f32 %v196_v58, 0.0 }
 0x15a   :  { %199 = vst [vmem:[#allocation9] sm:$0xff] %v198_v59 }
 0x15b   :  { %210 = dma.vmem_to_hbm [thread:$0]  %s206_s14, 128, %s208_s17, [#allocation5]  }
 0x15c   :  { %328 = dma.done.wait [#allocation5], 128  }
 0x15d   :  { %329 = vsyncadd [#allocation5], 4294967168 }
 0x15e   :  { %215 = vsyncpa [#allocation4], 1 }
 0x15f   :  { %216 = vsyncpa [#allocation7], 1 }
 0x160   :  { %217 = vsyncpa [#allocation5], 1 }

</bundles_post_ra>
